<compile_context>
chip_gen: v5e
topology: v5e:2x2
jax: 0.10.0
libtpu: 0.0.40
codegen_flags: <defaults>
</compile_context>

<pallas_src>
import numpy as np
import jax
import jax.numpy as jnp
from jax import lax
from jax.experimental import pallas as pl
from jax.experimental.pallas import tpu as pltpu


# ----------------------------- config --------------------------------------
B = 2           # batch
T = 8           # seq_size
C = 32          # n_embd
H = 4           # n_head
HS = C // H     # head_size
FF = 4 * C      # feed-forward hidden
N = B * T       # batch folded into rows
LN_EPS = 1e-5


# ----------------------------- kernel --------------------------------------
def transformer_block_kernel(
    x_ref,          # (N, C)      f32
    consts_ref,     # (N+H*N, 64) f32 : [bias (N, H*N) | head_mask (H*N, C)]
    vecs_ref,       # (8, 128)    f32 : packed LN / bias vectors
    wqkv_ref,       # (C, 3C)     bf16  [Wq*C**-0.5 | Wk | Wv]
    wo_ref,         # (C, C)      bf16
    wfc_ref,        # (C, FF)     bf16
    wpr_ref,        # (FF, C)     bf16
    o_ref,          # (N, C)      f32
):
    f32 = jnp.float32
    bf16 = jnp.bfloat16

    x = x_ref[...]                                   # (N, C)

    # ---- unpack constant slab (precomputed host-side, single DMA) ----
    bias = consts_ref[0:N, 0:H * N]                  # (N, H*N)  0 / -1e30
    head_mask = consts_ref[N:N + H * N, 0:C]         # (H*N, C)  0 / 1

    # ---- unpack LN / bias vector slab (single DMA, lane offset 0) ----
    ln1_w = vecs_ref[0:1, 0:C]
    ln1_b = vecs_ref[1:2, 0:C]
    bo    = vecs_ref[2:3, 0:C]
    ln2_w = vecs_ref[3:4, 0:C]
    ln2_b = vecs_ref[4:5, 0:C]
    bpr   = vecs_ref[5:6, 0:C]
    bfc   = vecs_ref[6:7, 0:FF]

    def layernorm(v, w, b):
        mu = jnp.mean(v, axis=-1, keepdims=True)
        var = jnp.mean((v - mu) ** 2, axis=-1, keepdims=True)
        return (v - mu) * lax.rsqrt(var + LN_EPS) * w + b

    # ---------------- Multi-head self-attention ----------------
    xn = layernorm(x, ln1_w, ln1_b)                                        # (N, C)

    # One fused QKV projection: bf16 MXU inputs, f32 accumulation.
    qkv = jnp.dot(xn.astype(bf16), wqkv_ref[...],
                  preferred_element_type=f32)                              # (N, 3C)
    q = qkv[:, 0:C]          # already scaled by C**-0.5 (folded into Wq)
    k = qkv[:, C:2 * C]
    v = qkv[:, 2 * C:3 * C]

    # Block-stack K / V over heads along sublanes: block h keeps only head-h lanes.
    k_rep = jnp.tile(k, (H, 1)) * head_mask                                # (H*N, C)
    v_rep = jnp.tile(v, (H, 1)) * head_mask                                # (H*N, C)

    # All-head scores in ONE matmul; rhs contracted on its last dim (no k.T).
    s = lax.dot_general(q, k_rep, (((1,), (1,)), ((), ())),
                        preferred_element_type=f32) + bias                 # (N, H*N)

    # Row-global max is a valid per-head softmax stabilizer (constant per row).
    m = jnp.max(s, axis=-1, keepdims=True)
    e = jnp.exp(s - m)                         # masked entries -> exactly 0

    # Per-output-lane softmax denominator and concat-head numerator, each one matmul.
    den = jnp.dot(e, head_mask, preferred_element_type=f32)               # (N, C)
    num = jnp.dot(e, v_rep, preferred_element_type=f32)                   # (N, C)
    attn = num * pl.reciprocal(den, approx=True)                          # (N, C)

    x1 = x + jnp.dot(attn.astype(bf16), wo_ref[...],
                     preferred_element_type=f32) + bo

    # ---------------- Feed-forward (MLP) ----------------
    yn = layernorm(x1, ln2_w, ln2_b)                                       # (N, C)
    hdn = jnp.dot(yn.astype(bf16), wfc_ref[...],
                  preferred_element_type=f32) + bfc                       # (N, FF)
    hdn = jnp.maximum(hdn, 0.0)                                            # ReLU
    mlp = jnp.dot(hdn.astype(bf16), wpr_ref[...],
                  preferred_element_type=f32) + bpr                       # (N, C)

    o_ref[...] = x1 + mlp                                                  # residual 2


# ----------------------------- wrapper --------------------------------------
def transformer_block(x, params):
    """x: (B, T, C) float32. Returns (B, T, C) float32."""
    (ln1_w, ln1_b, wq, wk, wv, wo, bo,
     ln2_w, ln2_b, wfc, bfc, wpr, bpr) = params

    # Fold batch into rows (free, wrapper side).
    x2 = x.reshape(N, C)

    # Fused QKV with the 1/sqrt(C) score scale folded into Wq; bf16 weights
    # (f32 MXU accumulation inside the kernel).
    wqkv = jnp.concatenate([wq * (C ** -0.5), wk, wv], axis=1).astype(jnp.bfloat16)
    wo_b = wo.astype(jnp.bfloat16)
    wfc_b = wfc.astype(jnp.bfloat16)
    wpr_b = wpr.astype(jnp.bfloat16)

    # ---- compile-time constants, built once host-side with NumPy -------------
    r = np.arange(N)[:, None]
    c = np.arange(N)[None, :]
    keep = ((r // T) == (c // T)) & ((c % T) <= (r % T))          # same-batch & causal
    bias16 = np.where(keep, 0.0, -1e30).astype(np.float32)        # (N, N)
    bias_all = np.tile(bias16, (1, H))                            # (N, H*N)
    head_mask = ((np.arange(C)[None, :] // HS) ==
                 (np.arange(H * N)[:, None] // N)).astype(np.float32)   # (H*N, C)
    consts = np.zeros((N + H * N, H * N), np.float32)             # (80, 64)
    consts[0:N, 0:H * N] = bias_all
    consts[N:, 0:C] = head_mask
    consts = jnp.asarray(consts)

    # ---- LN / bias vectors packed into one (8,128) slab (done once per call;
    #      in a real model this packing happens at parameter-load time) --------
    vecs = jnp.zeros((8, 128), jnp.float32)
    vecs = vecs.at[0, 0:C].set(ln1_w[0]).at[1, 0:C].set(ln1_b[0])
    vecs = vecs.at[2, 0:C].set(bo[0]).at[3, 0:C].set(ln2_w[0])
    vecs = vecs.at[4, 0:C].set(ln2_b[0]).at[5, 0:C].set(bpr[0])
    vecs = vecs.at[6, 0:FF].set(bfc[0])

    full = lambda shape: pl.BlockSpec(shape, lambda i: (0,) * len(shape))
    in_specs = [
        full((N, C)),                  # x (batch folded)
        full(consts.shape),            # packed constants (bias + head mask)
        full((8, 128)),                # packed LN/bias vectors
        full((C, 3 * C)),              # fused Wqkv (bf16)
        full((C, C)),                  # Wo   (bf16)
        full((C, FF)),                 # Wfc  (bf16)
        full((FF, C)),                 # Wproj(bf16)
    ]

    out = pl.pallas_call(
        transformer_block_kernel,
        out_shape=jax.ShapeDtypeStruct((N, C), jnp.float32),
        grid_spec=pltpu.PrefetchScalarGridSpec(
            num_scalar_prefetch=0,
            grid=(1,),                 # single grid step (latency-bound toy size)
            in_specs=in_specs,
            out_specs=pl.BlockSpec((N, C), lambda i: (0, 0)),
        ),
        compiler_params=pltpu.CompilerParams(
            dimension_semantics=("arbitrary",)),
    )(x2, consts, vecs, wqkv, wo_b, wfc_b, wpr_b)

    return out.reshape(B, T, C)


# ----------------------------- reference (pure JAX, f32) ---------------------
def reference(x, params):
    (ln1_w, ln1_b, wq, wk, wv, wo, bo, ln2_w, ln2_b,
     wfc, bfc, wpr, bpr) = params

    def ln(v, w, b):
        mu = v.mean(-1, keepdims=True)
        var = ((v - mu) ** 2).mean(-1, keepdims=True)
        return (v - mu) / jnp.sqrt(var + LN_EPS) * w + b

    xn = ln(x, ln1_w, ln1_b)
    q = xn @ wq
    k = xn @ wk
    v = xn @ wv
    qh = q.reshape(B, T, H, HS).transpose(0, 2, 1, 3)
    kh = k.reshape(B, T, H, HS).transpose(0, 2, 1, 3)
    vh = v.reshape(B, T, H, HS).transpose(0, 2, 1, 3)
    scores = jnp.einsum('bhqd,bhkd->bhqk', qh, kh) * (C ** -0.5)
    mask = jnp.tril(jnp.ones((T, T), bool))
    scores = jnp.where(mask, scores, -jnp.inf)
    p = jax.nn.softmax(scores, axis=-1)
    out = jnp.einsum('bhqk,bhkd->bhqd', p, vh)
    out = out.transpose(0, 2, 1, 3).reshape(B, T, C)
    x1 = x + (out @ wo + bo)
    yn = ln(x1, ln2_w, ln2_b)
    mlp = jnp.maximum(yn @ wfc + bfc, 0.0) @ wpr + bpr
    return x1 + mlp


# ----------------------------- main ------------------------------------------
if __name__ == "__main__":
    key = jax.random.PRNGKey(0)
    ks = jax.random.split(key, 16)

    def init(k, shape, scale=0.02):
        return (scale * jax.random.normal(k, shape)).astype(jnp.float32)

    x = jax.random.normal(ks[0], (B, T, C), dtype=jnp.float32)

    # Parameters, all in (in_dim, out_dim) layout for x @ W.
    ln1_w = jnp.ones((1, C), jnp.float32)
    ln1_b = jnp.zeros((1, C), jnp.float32)
    wq = init(ks[1], (C, C))
    wk = init(ks[2], (C, C))
    wv = init(ks[3], (C, C))
    wo = init(ks[4], (C, C))
    bo = init(ks[5], (1, C))
    ln2_w = jnp.ones((1, C), jnp.float32)
    ln2_b = jnp.zeros((1, C), jnp.float32)
    wfc = init(ks[6], (C, FF))
    bfc = init(ks[7], (1, FF))
    wpr = init(ks[8], (FF, C))
    bpr = init(ks[9], (1, C))

    params = (ln1_w, ln1_b, wq, wk, wv, wo, bo,
              ln2_w, ln2_b, wfc, bfc, wpr, bpr)

    out = transformer_block(x, params)
    out = jax.block_until_ready(out)

    ref = reference(x, (ln1_w[0], ln1_b[0], wq, wk, wv, wo, bo[0],
                        ln2_w[0], ln2_b[0], wfc, bfc[0], wpr, bpr[0]))
    assert out.shape == (B, T, C)
    # Tolerance vs the pure-f32 reference accounts for bf16 weight/activation
    # rounding on the MXU inputs and the EUP approximate softmax reciprocal
    # (measured error stays well below 1e-3 in the final output).
    assert jnp.allclose(out, ref, atol=2e-3, rtol=2e-3)

    print("KERNEL_OK")
</pallas_src>

<mosaic_0001>
module attributes {stable_mosaic.version = 11 : i64} {
  func.func @transformer_block_kernel(%arg0: i32, %arg1: memref<16x32xf32, #tpu.memory_space<vmem>>, %arg2: memref<80x64xf32, #tpu.memory_space<vmem>>, %arg3: memref<8x128xf32, #tpu.memory_space<vmem>>, %arg4: memref<32x96xbf16, #tpu.memory_space<vmem>>, %arg5: memref<32x32xbf16, #tpu.memory_space<vmem>>, %arg6: memref<32x128xbf16, #tpu.memory_space<vmem>>, %arg7: memref<128x32xbf16, #tpu.memory_space<vmem>>, %arg8: memref<16x32xf32, #tpu.memory_space<vmem>>) attributes {dimension_semantics = [#tpu.dimension_semantics<arbitrary>], iteration_bounds = array<i64: 1>, scalar_prefetch = 0 : i64, scratch_operands = 0 : i64, tpu.core_type = #tpu.core_type<tc>, window_params = [{pipeline_mode = #tpu.pipeline_mode<synchronous>, transform_indices = @transform_0, window_bounds = array<i64: 16, 32>}, {pipeline_mode = #tpu.pipeline_mode<synchronous>, transform_indices = @transform_1, window_bounds = array<i64: 80, 64>}, {pipeline_mode = #tpu.pipeline_mode<synchronous>, transform_indices = @transform_2, window_bounds = array<i64: 8, 128>}, {pipeline_mode = #tpu.pipeline_mode<synchronous>, transform_indices = @transform_3, window_bounds = array<i64: 32, 96>}, {pipeline_mode = #tpu.pipeline_mode<synchronous>, transform_indices = @transform_4, window_bounds = array<i64: 32, 32>}, {pipeline_mode = #tpu.pipeline_mode<synchronous>, transform_indices = @transform_5, window_bounds = array<i64: 32, 128>}, {pipeline_mode = #tpu.pipeline_mode<synchronous>, transform_indices = @transform_6, window_bounds = array<i64: 128, 32>}, {pipeline_mode = #tpu.pipeline_mode<synchronous>, transform_indices = @transform_7, window_bounds = array<i64: 16, 32>}]} {
    %c0 = arith.constant 0 : index
    %c0_0 = arith.constant 0 : index
    %0 = vector.load %arg1[%c0, %c0_0] : memref<16x32xf32, #tpu.memory_space<vmem>>, vector<16x32xf32>
    %c0_1 = arith.constant 0 : index
    %c0_2 = arith.constant 0 : index
    %1 = vector.load %arg2[%c0_1, %c0_2] : memref<80x64xf32, #tpu.memory_space<vmem>>, vector<16x64xf32>
    %c16 = arith.constant 16 : index
    %c0_3 = arith.constant 0 : index
    %2 = vector.load %arg2[%c16, %c0_3] : memref<80x64xf32, #tpu.memory_space<vmem>>, vector<64x32xf32>
    %c0_4 = arith.constant 0 : index
    %c0_5 = arith.constant 0 : index
    %3 = vector.load %arg3[%c0_4, %c0_5] : memref<8x128xf32, #tpu.memory_space<vmem>>, vector<1x32xf32>
    %c1 = arith.constant 1 : index
    %c0_6 = arith.constant 0 : index
    %4 = vector.load %arg3[%c1, %c0_6] : memref<8x128xf32, #tpu.memory_space<vmem>>, vector<1x32xf32>
    %c2 = arith.constant 2 : index
    %c0_7 = arith.constant 0 : index
    %5 = vector.load %arg3[%c2, %c0_7] : memref<8x128xf32, #tpu.memory_space<vmem>>, vector<1x32xf32>
    %c3 = arith.constant 3 : index
    %c0_8 = arith.constant 0 : index
    %6 = vector.load %arg3[%c3, %c0_8] : memref<8x128xf32, #tpu.memory_space<vmem>>, vector<1x32xf32>
    %c4 = arith.constant 4 : index
    %c0_9 = arith.constant 0 : index
    %7 = vector.load %arg3[%c4, %c0_9] : memref<8x128xf32, #tpu.memory_space<vmem>>, vector<1x32xf32>
    %c5 = arith.constant 5 : index
    %c0_10 = arith.constant 0 : index
    %8 = vector.load %arg3[%c5, %c0_10] : memref<8x128xf32, #tpu.memory_space<vmem>>, vector<1x32xf32>
    %c6 = arith.constant 6 : index
    %c0_11 = arith.constant 0 : index
    %9 = vector.load %arg3[%c6, %c0_11] : memref<8x128xf32, #tpu.memory_space<vmem>>, vector<1x128xf32>
    %cst = arith.constant dense<0.000000e+00> : vector<16xf32>
    %10 = vector.multi_reduction <add>, %0, %cst [1] : vector<16x32xf32> to vector<16xf32>
    %11 = vector.shape_cast %10 : vector<16xf32> to vector<16x1xf32>
    %cst_12 = arith.constant 3.200000e+01 : f32
    %12 = vector.broadcast %cst_12 : f32 to vector<16x1xf32>
    %13 = arith.divf %11, %12 : vector<16x1xf32>
    %14 = vector.broadcast %13 : vector<16x1xf32> to vector<16x32xf32>
    %15 = arith.subf %0, %14 : vector<16x32xf32>
    %16 = arith.mulf %15, %15 : vector<16x32xf32>
    %cst_13 = arith.constant dense<0.000000e+00> : vector<16xf32>
    %17 = vector.multi_reduction <add>, %16, %cst_13 [1] : vector<16x32xf32> to vector<16xf32>
    %18 = vector.shape_cast %17 : vector<16xf32> to vector<16x1xf32>
    %cst_14 = arith.constant 3.200000e+01 : f32
    %19 = vector.broadcast %cst_14 : f32 to vector<16x1xf32>
    %20 = arith.divf %18, %19 : vector<16x1xf32>
    %21 = vector.broadcast %13 : vector<16x1xf32> to vector<16x32xf32>
    %22 = arith.subf %0, %21 : vector<16x32xf32>
    %cst_15 = arith.constant 9.99999974E-6 : f32
    %23 = vector.broadcast %cst_15 : f32 to vector<16x1xf32>
    %24 = arith.addf %20, %23 : vector<16x1xf32>
    %25 = math.rsqrt %24 : vector<16x1xf32>
    %26 = vector.broadcast %25 : vector<16x1xf32> to vector<16x32xf32>
    %27 = arith.mulf %22, %26 : vector<16x32xf32>
    %28 = vector.broadcast %3 : vector<1x32xf32> to vector<16x32xf32>
    %29 = arith.mulf %27, %28 : vector<16x32xf32>
    %30 = vector.broadcast %4 : vector<1x32xf32> to vector<16x32xf32>
    %31 = arith.addf %29, %30 : vector<16x32xf32>
    %32 = arith.truncf %31 : vector<16x32xf32> to vector<16x32xbf16>
    %c0_16 = arith.constant 0 : index
    %c0_17 = arith.constant 0 : index
    %33 = vector.load %arg4[%c0_16, %c0_17] : memref<32x96xbf16, #tpu.memory_space<vmem>>, vector<32x96xbf16>
    %cst_18 = arith.constant dense<0.000000e+00> : vector<16x96xf32>
    %34 = tpu.matmul %32, %33, %cst_18 {dimension_numbers = #tpu.dot_dimension_numbers<[1], [0], [0], [1], [0, 0, 1, 1], [], []>} : vector<16x32xbf16>, vector<32x96xbf16>, vector<16x96xf32> -> vector<16x96xf32>
    %35 = vector.extract_strided_slice %34 {offsets = [0, 0], sizes = [16, 32], strides = [1, 1]} : vector<16x96xf32> to vector<16x32xf32>
    %36 = vector.extract_strided_slice %34 {offsets = [0, 32], sizes = [16, 32], strides = [1, 1]} : vector<16x96xf32> to vector<16x32xf32>
    %37 = vector.extract_strided_slice %34 {offsets = [0, 64], sizes = [16, 32], strides = [1, 1]} : vector<16x96xf32> to vector<16x32xf32>
    %38 = tpu.concatenate %36, %36, %36, %36 in 0 : vector<16x32xf32>, vector<16x32xf32>, vector<16x32xf32>, vector<16x32xf32> -> vector<64x32xf32>
    %39 = arith.mulf %38, %2 : vector<64x32xf32>
    %40 = tpu.concatenate %37, %37, %37, %37 in 0 : vector<16x32xf32>, vector<16x32xf32>, vector<16x32xf32>, vector<16x32xf32> -> vector<64x32xf32>
    %41 = arith.mulf %40, %2 : vector<64x32xf32>
    %cst_19 = arith.constant dense<0.000000e+00> : vector<16x64xf32>
    %42 = tpu.matmul %35, %39, %cst_19 {dimension_numbers = #tpu.dot_dimension_numbers<[1], [1], [0], [0], [0, 0, 1, 0], [], []>} : vector<16x32xf32>, vector<64x32xf32>, vector<16x64xf32> -> vector<16x64xf32>
    %43 = arith.addf %42, %1 : vector<16x64xf32>
    %cst_20 = arith.constant dense<0xFF800000> : vector<16xf32>
    %44 = vector.multi_reduction <maximumf>, %43, %cst_20 [1] : vector<16x64xf32> to vector<16xf32>
    %45 = vector.shape_cast %44 : vector<16xf32> to vector<16x1xf32>
    %46 = vector.broadcast %45 : vector<16x1xf32> to vector<16x64xf32>
    %47 = arith.subf %43, %46 : vector<16x64xf32>
    %48 = math.exp %47 : vector<16x64xf32>
    %cst_21 = arith.constant dense<0.000000e+00> : vector<16x32xf32>
    %49 = tpu.matmul %48, %2, %cst_21 {dimension_numbers = #tpu.dot_dimension_numbers<[1], [0], [0], [1], [0, 0, 1, 1], [], []>} : vector<16x64xf32>, vector<64x32xf32>, vector<16x32xf32> -> vector<16x32xf32>
    %cst_22 = arith.constant dense<0.000000e+00> : vector<16x32xf32>
    %50 = tpu.matmul %48, %41, %cst_22 {dimension_numbers = #tpu.dot_dimension_numbers<[1], [0], [0], [1], [0, 0, 1, 1], [], []>} : vector<16x64xf32>, vector<64x32xf32>, vector<16x32xf32> -> vector<16x32xf32>
    %51 = tpu.reciprocal %49 {approx = true} : vector<16x32xf32> -> vector<16x32xf32>
    %52 = arith.mulf %50, %51 : vector<16x32xf32>
    %53 = arith.truncf %52 : vector<16x32xf32> to vector<16x32xbf16>
    %c0_23 = arith.constant 0 : index
    %c0_24 = arith.constant 0 : index
    %54 = vector.load %arg5[%c0_23, %c0_24] : memref<32x32xbf16, #tpu.memory_space<vmem>>, vector<32x32xbf16>
    %cst_25 = arith.constant dense<0.000000e+00> : vector<16x32xf32>
    %55 = tpu.matmul %53, %54, %cst_25 {dimension_numbers = #tpu.dot_dimension_numbers<[1], [0], [0], [1], [0, 0, 1, 1], [], []>} : vector<16x32xbf16>, vector<32x32xbf16>, vector<16x32xf32> -> vector<16x32xf32>
    %56 = arith.addf %0, %55 : vector<16x32xf32>
    %57 = vector.broadcast %5 : vector<1x32xf32> to vector<16x32xf32>
    %58 = arith.addf %56, %57 : vector<16x32xf32>
    %cst_26 = arith.constant dense<0.000000e+00> : vector<16xf32>
    %59 = vector.multi_reduction <add>, %58, %cst_26 [1] : vector<16x32xf32> to vector<16xf32>
    %60 = vector.shape_cast %59 : vector<16xf32> to vector<16x1xf32>
    %cst_27 = arith.constant 3.200000e+01 : f32
    %61 = vector.broadcast %cst_27 : f32 to vector<16x1xf32>
    %62 = arith.divf %60, %61 : vector<16x1xf32>
    %63 = vector.broadcast %62 : vector<16x1xf32> to vector<16x32xf32>
    %64 = arith.subf %58, %63 : vector<16x32xf32>
    %65 = arith.mulf %64, %64 : vector<16x32xf32>
    %cst_28 = arith.constant dense<0.000000e+00> : vector<16xf32>
    %66 = vector.multi_reduction <add>, %65, %cst_28 [1] : vector<16x32xf32> to vector<16xf32>
    %67 = vector.shape_cast %66 : vector<16xf32> to vector<16x1xf32>
    %cst_29 = arith.constant 3.200000e+01 : f32
    %68 = vector.broadcast %cst_29 : f32 to vector<16x1xf32>
    %69 = arith.divf %67, %68 : vector<16x1xf32>
    %70 = vector.broadcast %62 : vector<16x1xf32> to vector<16x32xf32>
    %71 = arith.subf %58, %70 : vector<16x32xf32>
    %cst_30 = arith.constant 9.99999974E-6 : f32
    %72 = vector.broadcast %cst_30 : f32 to vector<16x1xf32>
    %73 = arith.addf %69, %72 : vector<16x1xf32>
    %74 = math.rsqrt %73 : vector<16x1xf32>
    %75 = vector.broadcast %74 : vector<16x1xf32> to vector<16x32xf32>
    %76 = arith.mulf %71, %75 : vector<16x32xf32>
    %77 = vector.broadcast %6 : vector<1x32xf32> to vector<16x32xf32>
    %78 = arith.mulf %76, %77 : vector<16x32xf32>
    %79 = vector.broadcast %7 : vector<1x32xf32> to vector<16x32xf32>
    %80 = arith.addf %78, %79 : vector<16x32xf32>
    %81 = arith.truncf %80 : vector<16x32xf32> to vector<16x32xbf16>
    %c0_31 = arith.constant 0 : index
    %c0_32 = arith.constant 0 : index
    %82 = vector.load %arg6[%c0_31, %c0_32] : memref<32x128xbf16, #tpu.memory_space<vmem>>, vector<32x128xbf16>
    %cst_33 = arith.constant dense<0.000000e+00> : vector<16x128xf32>
    %83 = tpu.matmul %81, %82, %cst_33 {dimension_numbers = #tpu.dot_dimension_numbers<[1], [0], [0], [1], [0, 0, 1, 1], [], []>} : vector<16x32xbf16>, vector<32x128xbf16>, vector<16x128xf32> -> vector<16x128xf32>
    %84 = vector.broadcast %9 : vector<1x128xf32> to vector<16x128xf32>
    %85 = arith.addf %83, %84 : vector<16x128xf32>
    %cst_34 = arith.constant 0.000000e+00 : f32
    %86 = vector.broadcast %cst_34 : f32 to vector<16x128xf32>
    %87 = arith.maximumf %85, %86 : vector<16x128xf32>
    %88 = arith.truncf %87 : vector<16x128xf32> to vector<16x128xbf16>
    %c0_35 = arith.constant 0 : index
    %c0_36 = arith.constant 0 : index
    %89 = vector.load %arg7[%c0_35, %c0_36] : memref<128x32xbf16, #tpu.memory_space<vmem>>, vector<128x32xbf16>
    %cst_37 = arith.constant dense<0.000000e+00> : vector<16x32xf32>
    %90 = tpu.matmul %88, %89, %cst_37 {dimension_numbers = #tpu.dot_dimension_numbers<[1], [0], [0], [1], [0, 0, 1, 1], [], []>} : vector<16x128xbf16>, vector<128x32xbf16>, vector<16x32xf32> -> vector<16x32xf32>
    %91 = vector.broadcast %8 : vector<1x32xf32> to vector<16x32xf32>
    %92 = arith.addf %90, %91 : vector<16x32xf32>
    %93 = arith.addf %58, %92 : vector<16x32xf32>
    %c0_38 = arith.constant 0 : index
    %c0_39 = arith.constant 0 : index
    %94 = vector.load %arg8[%c0_38, %c0_39] : memref<16x32xf32, #tpu.memory_space<vmem>>, vector<16x32xf32>
    tpu.vector_store %arg8[%c0_38, %c0_39], %93 {strides = array<i32>} : memref<16x32xf32, #tpu.memory_space<vmem>>, vector<16x32xf32>,
    return
  }
  func.func @transform_0(%arg0: i32) -> (i32, i32) {
    %c0_i32 = arith.constant 0 : i32
    %c0_i32_0 = arith.constant 0 : i32
    %c0_i32_1 = arith.constant 0 : i32
    return %c0_i32, %c0_i32_0 : i32, i32
  }
  func.func @transform_1(%arg0: i32) -> (i32, i32) {
    %c0_i32 = arith.constant 0 : i32
    %c0_i32_0 = arith.constant 0 : i32
    %c0_i32_1 = arith.constant 0 : i32
    return %c0_i32, %c0_i32_0 : i32, i32
  }
  func.func @transform_2(%arg0: i32) -> (i32, i32) {
    %c0_i32 = arith.constant 0 : i32
    %c0_i32_0 = arith.constant 0 : i32
    %c0_i32_1 = arith.constant 0 : i32
    return %c0_i32, %c0_i32_0 : i32, i32
  }
  func.func @transform_3(%arg0: i32) -> (i32, i32) {
    %c0_i32 = arith.constant 0 : i32
    %c0_i32_0 = arith.constant 0 : i32
    %c0_i32_1 = arith.constant 0 : i32
    return %c0_i32, %c0_i32_0 : i32, i32
  }
  func.func @transform_4(%arg0: i32) -> (i32, i32) {
    %c0_i32 = arith.constant 0 : i32
    %c0_i32_0 = arith.constant 0 : i32
    %c0_i32_1 = arith.constant 0 : i32
    return %c0_i32, %c0_i32_0 : i32, i32
  }
  func.func @transform_5(%arg0: i32) -> (i32, i32) {
    %c0_i32 = arith.constant 0 : i32
    %c0_i32_0 = arith.constant 0 : i32
    %c0_i32_1 = arith.constant 0 : i32
    return %c0_i32, %c0_i32_0 : i32, i32
  }
  func.func @transform_6(%arg0: i32) -> (i32, i32) {
    %c0_i32 = arith.constant 0 : i32
    %c0_i32_0 = arith.constant 0 : i32
    %c0_i32_1 = arith.constant 0 : i32
    return %c0_i32, %c0_i32_0 : i32, i32
  }
  func.func @transform_7(%arg0: i32) -> (i32, i32) {
    %c0_i32 = arith.constant 0 : i32
    %c0_i32_0 = arith.constant 0 : i32
    %c0_i32_1 = arith.constant 0 : i32
    return %c0_i32, %c0_i32_0 : i32, i32
  }
}

</mosaic_0001>

<bundles_post_ra>
// kernel: tpu_custom_call.1
= control target key start
LH: loop header
LB: loop body
LE: loop exit
PB: predicated region body
PF: predicated region fallthrough
CT: control target
= control target key end

     0   :  { %vm47_vm0 = vcmask 261120   ;;  %s1059_s0 = inlined_call_operand.vmem [shape: f32[16,32], index: 0, kind: input, shape index: {}]   ;;  %s1060_s1 = inlined_call_operand.vmem [shape: f32[80,64], index: 1, kind: input, shape index: {}]   ;;  %s1061_s2 = inlined_call_operand.vmem [shape: f32[8,128], index: 2, kind: input, shape index: {}]   ;;  %s1062_s3 = inlined_call_operand.vmem [shape: bf16[32,96], index: 3, kind: input, shape index: {}]   ;;  %s1063_s4 = inlined_call_operand.vmem [shape: bf16[32,32], index: 4, kind: input, shape index: {}]   ;;  %s1064_s5 = inlined_call_operand.vmem [shape: bf16[32,128], index: 5, kind: input, shape index: {}]   ;;  %s1065_s6 = inlined_call_operand.vmem [shape: bf16[128,32], index: 6, kind: input, shape index: {}]   ;;  %s1066_s7 = inlined_call_operand.hbm [shape: f32[16,32], index: 7, kind: output, shape index: {}]  }
   0x1   :  { %v824_v0 = vld [vmem:[%s1059_s0] sm:$0xff] }
   0x2   :  { %v48_v1 = vsel %vm47_vm0, %v824_v0, 0.0 }
   0x3   :  { %49 = vadd.xlane.f32.xlu0 %v48_v1 }
   0x4   :  { %12 = vsyncpa [#allocation3], 0  ;;  %v831_v2 = vld [vmem:[%s1059_s0 + $0x8] sm:$0xff]  ;;  %v774_v4 = vmov 32.0   ;;  %v682_v23 = vld [vmem:[%s1062_s3] sm:$0xff]  ;;  %s775_s12 = smov 32  }
   0x5   :  { %v51_v3 = vsel %vm47_vm0, %v831_v2, 0.0  ;;  %730 = vrcp.f32 %v774_v4  ;;  %v683_v21 = vld [vmem:[%s1062_s3 + $0x8] sm:$0xff]  ;;  %v853_v26 = vld [vmem:[%s1060_s1 + $0x38] sm:$0xff]  ;;  %v867_v29 = vld [vmem:[%s1060_s1 + $0x30] sm:$0xff]  ;;  %s776_s0 = smov 96   ;;  %s777_s28 = smov 64  }
   0x6   :  { %131 = vmatpush.bf16.msra.mxu0 %v683_v21  ;;  %v858_v27 = vld [vmem:[%s1060_s1 + $0x48] sm:$0xff]  ;;  %v876_v31 = vld [vmem:[%s1060_s1 + $0x40] sm:$0xff]  ;;  %v882_v35 = vld [vmem:[%s1060_s1 + $0x10] sm:$0xff]  ;;  %vm280_vm8 = vcmask 523264   ;;  %s597_s16 = sshll.u32 %s1066_s7, 4  ;;  %s780_s17 = smov 8   ;;  %s598_s16 = int_to_ptr.hbm [resolvable:$true] %s597_s16 }
   0x7   :  { %161 = vrot.lane.b32.xlu2 %v858_v27, %s775_s12  ;;  %307 = vmatpush.msra.mxu2 %v858_v27  ;;  %v893_v38 = vld [vmem:[%s1060_s1 + $0x28] sm:$0xff]  ;;  %v899_v40 = vld [vmem:[%s1060_s1 + $0x20] sm:$0xff]  ;;  %v33_v44 = vld [vmem:[%s1060_s1 + $0x18] sm:$0xff] }
   0x8   :  { %v723_v50 = vld [vmem:[%s1061_s2] ss:$0 sm:$0xff]  ;;  %v724_v55 = vld [vmem:[%s1061_s2 + $0x1] ss:$0 sm:$0xff] }
   0x9   :  { %308 = vmatpush.msra.mxu2 %v876_v31 }
   0xa   :  { %132 = vmatpush.bf16.msra.mxu0 %v682_v23 }
   0xb   :  { %52 = vadd.xlane.f32.xlu0 %v51_v3  ;;  %v731_v5 = vpop.eup %730  ;;  %309 = vmatpush.msra.mxu2 %v853_v26 }
   0xc   :  { %v55_v6 = vmul.f32 32.0, %v731_v5  ;;  %vm59_vm1 = vweird.f32 %v731_v5 }
   0xd   :  { %310 = vmatpush.msra.mxu2 %v867_v29 }
   0xe   :  { %v56_v7 = vsub.f32 1.0, %v55_v6 }
   0xf   :  { %159 = vrot.lane.b32.xlu2 %v876_v31, %s775_s12  ;;  %311 = vmatpush.msra.mxu2 %v893_v38 }
  0x10   :  { %v57_v8 = vmul.f32 %v731_v5, %v56_v7 }
  0x11   :  { %312 = vmatpush.msra.mxu2 %v899_v40 }
  0x12   :  { %v58_v9 = vadd.f32 %v731_v5, %v57_v8 }
  0x13   :  { %313 = vmatpush.msra.mxu2 %v33_v44 }
  0x14   :  { %v835_v10 = vsel %vm59_vm1, %v731_v5, %v58_v9 }
  0x15   :  { %314 = vmatpush.msra.mxu2 %v882_v35 }
  0x17   :  { %153 = vrot.lane.b32.xlu2 %v893_v38, %s775_s12 }
  0x1f   :  { %157 = vrot.lane.b32.xlu0 %v853_v26, %s775_s12  ;;  %151 = vrot.lane.b32.xlu2 %v899_v40, %s775_s12 }
  0x27   :  { %147 = vrot.lane.b32.xlu0 %v882_v35, %s775_s12  ;;  %149 = vrot.lane.b32.xlu2 %v33_v44, %s775_s12 }
  0x61   :  { %v162_v60 = vpop.permute.xlu2 %161 }
  0x69   :  { %v160_v61 = vpop.permute.xlu2 %159 }
  0x71   :  { %v154_v1 = vpop.permute.xlu2 %153 }
  0x76   :  { %v50_v11 = vpop.xlane.xlu0 %49 }
  0x77   :  { %v61_v12 = vmul.f32 %v835_v10, %v50_v11 }
  0x79   :  { %v63_v13 = vsub.f32 %v824_v0, %v61_v12  ;;  %v152_v8 = vpop.permute.xlu2 %151 }
  0x7b   :  { %v65_v14 = vmul.f32 %v63_v13, %v63_v13 }
  0x7d   :  { %v67_v15 = vsel %vm47_vm0, %v65_v14, 0.0 }
  0x7e   :  { %68 = vadd.xlane.f32.xlu1 %v67_v15  ;;  %v53_v16 = vpop.xlane.xlu0 %52 }
  0x7f   :  { %v62_v17 = vmul.f32 %v835_v10, %v53_v16 }
  0x81   :  { %v64_v18 = vsub.f32 %v831_v2, %v62_v17  ;;  %v150_v15 = vpop.permute.xlu2 %149 }
  0x83   :  { %v66_v19 = vmul.f32 %v64_v18, %v64_v18 }
  0x85   :  { %v70_v20 = vsel %vm47_vm0, %v66_v19, 0.0 }
  0x86   :  { %71 = vadd.xlane.f32.xlu1 %v70_v20 }
  0x91   :  { %v158_v3 = vpop.permute.xlu0 %157 }
  0x99   :  { %v148_v11 = vpop.permute.xlu0 %147 }
  0x9f   :  { %155 = vrot.lane.b32.xlu1 %v867_v29, %s775_s12 }
  0xf1   :  { %v69_v22 = vpop.xlane.xlu1 %68 }
  0xf2   :  { %v73_v24 = vmul.f32 %v69_v22, %v835_v10 }
  0xf4   :  { %v75_v25 = vadd.f32 1e-05, %v73_v24 }
  0xf6   :  { %732 = vrsqrt.f32 %v75_v25  ;;  %vm83_vm3 = vweird.f32 %v75_v25 }
  0xf9   :  { %v72_v28 = vpop.xlane.xlu1 %71 }
  0xfa   :  { %v74_v30 = vmul.f32 %v72_v28, %v835_v10 }
  0xfc   :  { %v733_v32 = vpop.eup %732  ;;  %v76_v33 = vadd.f32 1e-05, %v74_v30 }
  0xfd   :  { %v78_v34 = vmul.f32 %v733_v32, %v75_v25  ;;  %vm84_vm2 = vweird.f32 %v733_v32 }
  0xfe   :  { %734 = vrsqrt.f32 %v76_v33  ;;  %vm85_vm4 = vmor %vm83_vm3, %vm84_vm2  ;;  %vm93_vm6 = vweird.f32 %v76_v33 }
  0xff   :  { %v79_v36 = vmul.f32 %v733_v32, %v78_v34 }
 0x101   :  { %v80_v37 = vmul.f32 0.5, %v79_v36 }
 0x103   :  { %v81_v39 = vsub.f32 1.5, %v80_v37 }
 0x104   :  { %v735_v41 = vpop.eup %734 }
 0x105   :  { %v82_v42 = vmul.f32 %v733_v32, %v81_v39  ;;  %v88_v43 = vmul.f32 %v735_v41, %v76_v33  ;;  %vm94_vm5 = vweird.f32 %v735_v41 }
 0x106   :  { %vm95_vm7 = vmor %vm93_vm6, %vm94_vm5 }
 0x107   :  { %v89_v45 = vmul.f32 %v735_v41, %v88_v43  ;;  %v86_v46 = vsel %vm85_vm4, %v733_v32, %v82_v42 }
 0x108   :  { %v97_v49 = vmul.f32 %v86_v46, %v63_v13 }
 0x109   :  { %v90_v47 = vmul.f32 0.5, %v89_v45 }
 0x10a   :  { %v100_v54 = vmul.f32 %v723_v50, %v97_v49 }
 0x10b   :  { %v91_v48 = vsub.f32 1.5, %v90_v47 }
 0x10c   :  { %v103_v57 = vadd.f32 %v724_v55, %v100_v54 }
 0x10d   :  { %v92_v51 = vmul.f32 %v735_v41, %v91_v48 }
 0x10f   :  { %v96_v52 = vsel %vm95_vm7, %v735_v41, %v92_v51 }
 0x110   :  { %v98_v53 = vmul.f32 %v96_v52, %v64_v18 }
 0x111   :  { %v156_v9 = vpop.permute.xlu1 %155 }
 0x112   :  { %v101_v56 = vmul.f32 %v723_v50, %v98_v53 }
 0x114   :  { %v104_v58 = vadd.f32 %v724_v55, %v101_v56 }
 0x116   :  { %v105_v59 = vpack.c.bf16 %v104_v58, %v103_v57  ;;  %v30_v57 = vld [vmem:[%s1060_s1] sm:$0xff] }
 0x118   :  { %617 = vmatmul.msk.bf16.vlgmr.msra.gmra.mxu0 %vm47_vm0, %v105_v59 }
 0x195   :  { %v918_v62 = vpop.f32.mrf.mxu0 }
 0x196   :  { %v177_v63 = vmul.f32 %v160_v61, %v918_v62  ;;  %v175_v12 = vmul.f32 %v156_v9, %v918_v62  ;;  %v171_v13 = vmul.f32 %v148_v11, %v918_v62  ;;  %v173_v14 = vmul.f32 %v152_v8, %v918_v62  ;;  %v31_v61 = vld [vmem:[%s1060_s1 + $0x8] sm:$0xff] }
 0x198   :  { %231 = vrot.lane.b32.xlu1 %v177_v63, %s776_s0 }
 0x19d   :  { %v921_v4 = vpop.f32.mrf.mxu0 }
 0x19e   :  { %v178_v5 = vmul.f32 %v162_v60, %v921_v4  ;;  %v174_v6 = vmul.f32 %v154_v1, %v921_v4  ;;  %v176_v7 = vmul.f32 %v158_v3, %v921_v4  ;;  %v172_v16 = vmul.f32 %v150_v15, %v921_v4 }
 0x1a0   :  { %233 = vrot.lane.b32.xlu2 %v178_v5, %s776_s0  ;;  %225 = vrot.lane.b32.xlu1 %v174_v6, %s776_s0 }
 0x1a1   :  { %229 = vrot.lane.b32.xlu0 %v176_v7, %s776_s0 }
 0x1a8   :  { %227 = vrot.lane.b32.xlu2 %v175_v12, %s776_s0  ;;  %219 = vrot.lane.b32.xlu1 %v171_v13, %s776_s0  ;;  %v685_v12 = vld [vmem:[%s1063_s4 + $0x8] sm:$0xff]  ;;  %v684_v13 = vld [vmem:[%s1063_s4] sm:$0xff] }
 0x1a9   :  { %223 = vrot.lane.b32.xlu0 %v173_v14, %s776_s0 }
 0x1b0   :  { %221 = vrot.lane.b32.xlu2 %v172_v16, %s776_s0  ;;  %189 = vrot.lane.b32.xlu1 %v853_v26, %s777_s28 }
 0x1b1   :  { %193 = vrot.lane.b32.xlu0 %v858_v27, %s777_s28 }
 0x1b8   :  { %191 = vrot.lane.b32.xlu2 %v876_v31, %s777_s28  ;;  %183 = vrot.lane.b32.xlu1 %v899_v40, %s777_s28 }
 0x1b9   :  { %187 = vrot.lane.b32.xlu0 %v867_v29, %s777_s28 }
 0x1c0   :  { %185 = vrot.lane.b32.xlu2 %v893_v38, %s777_s28 }
 0x1c1   :  { %181 = vrot.lane.b32.xlu0 %v33_v44, %s777_s28 }
 0x1c8   :  { %179 = vrot.lane.b32.xlu2 %v882_v35, %s777_s28 }
 0x1fa   :  { %v234_v17 = vpop.permute.xlu2 %233 }
 0x1fb   :  { %618 = vmatpush.xpose.msk.msra.mxu1 %vm47_vm0, %v234_v17 }
 0x202   :  { %v228_v19 = vpop.permute.xlu2 %227 }
 0x20a   :  { %v232_v18 = vpop.permute.xlu1 %231  ;;  %v222_v22 = vpop.permute.xlu2 %221 }
 0x20b   :  { %619 = vmatpush.xpose.msk.msra.mxu1 %vm47_vm0, %v232_v18 }
 0x212   :  { %v226_v20 = vpop.permute.xlu1 %225  ;;  %v192_v25 = vpop.permute.xlu2 %191 }
 0x213   :  { %v230_v21 = vpop.permute.xlu0 %229  ;;  %v209_v27 = vmul.f32 %v192_v25, %v918_v62 }
 0x214   :  { %620 = vmatpush.xpose.msk.msra.mxu1 %vm47_vm0, %v230_v21 }
 0x218   :  { %621 = vmatpush.xpose.msk.msra.mxu1 %vm47_vm0, %v228_v19 }
 0x21a   :  { %v220_v23 = vpop.permute.xlu1 %219  ;;  %v186_v35 = vpop.permute.xlu2 %185 }
 0x21b   :  { %v224_v24 = vpop.permute.xlu0 %223  ;;  %v206_v38 = vmul.f32 %v186_v35, %v921_v4 }
 0x21c   :  { %622 = vmatpush.xpose.msk.msra.mxu1 %vm47_vm0, %v226_v20 }
 0x220   :  { %623 = vmatpush.xpose.msk.msra.mxu1 %vm47_vm0, %v224_v24 }
 0x222   :  { %v190_v29 = vpop.permute.xlu1 %189  ;;  %v180_v41 = vpop.permute.xlu2 %179 }
 0x223   :  { %v194_v26 = vpop.permute.xlu0 %193  ;;  %v208_v32 = vmul.f32 %v190_v29, %v921_v4  ;;  %v203_v43 = vmul.f32 %v180_v41, %v918_v62 }
 0x224   :  { %v210_v28 = vmul.f32 %v194_v26, %v921_v4  ;;  %624 = vmatpush.xpose.msk.msra.mxu1 %vm47_vm0, %v222_v22 }
 0x226   :  { %v703_v30 = vpack.i.bf16 %v209_v27, %v210_v28 }
 0x228   :  { %625 = vmatpush.xpose.msk.msra.mxu1 %vm47_vm0, %v220_v23  ;;  %704 = vrot.lane.b32.xlu2 %v703_v30, %s777_s28  ;;  %v725_v23 = vld [vmem:[%s1061_s2 + $0x2] ss:$0 sm:$0xff] }
 0x22a   :  { %v184_v36 = vpop.permute.xlu1 %183 }
 0x22b   :  { %626 = vmatmul.msk.f32.vlgmr.msra.gmra.mxu1 %vm47_vm0, %v918_v62  ;;  %v188_v31 = vpop.permute.xlu0 %187  ;;  %v205_v37 = vmul.f32 %v184_v36, %v918_v62 }
 0x22c   :  { %v207_v33 = vmul.f32 %v188_v31, %v918_v62 }
 0x22d   :  { %v713_v39 = vpack.i.bf16 %v205_v37, %v206_v38 }
 0x22e   :  { %v708_v34 = vpack.i.bf16 %v207_v33, %v208_v32 }
 0x230   :  { %709 = vrot.lane.b32.xlu2 %v708_v34, %s777_s28 }
 0x233   :  { %627 = vmatmul.msk.f32.gmra.mxu1 %vm47_vm0, %v921_v4  ;;  %v182_v40 = vpop.permute.xlu0 %181 }
 0x234   :  { %v204_v42 = vmul.f32 %v182_v40, %v921_v4  ;;  %v687_v40 = vld [vmem:[%s1064_s5 + $0x8] sm:$0xff] }
 0x235   :  { %497 = vmatpush.bf16.msrb.mxu2 %v687_v40 }
 0x236   :  { %v718_v44 = vpack.i.bf16 %v203_v43, %v204_v42  ;;  %v686_v42 = vld [vmem:[%s1064_s5] sm:$0xff] }
 0x238   :  { %714 = vrot.lane.b32.xlu2 %v713_v39, %s777_s28 }
 0x239   :  { %498 = vmatpush.bf16.msrb.mxu2 %v686_v42 }
 0x240   :  { %719 = vrot.lane.b32.xlu2 %v718_v44, %s777_s28 }
 0x282   :  { %v705_v45 = vpop.permute.xlu2 %704 }
 0x283   :  { %v706_v46 = vunpack.i.l.bf16 %v705_v45  ;;  %v707_v47 = vunpack.i.h.bf16 %v705_v45  ;;  %v695_v45 = vld [vmem:[%s1065_s6 + $0x38] sm:$0xff] }
 0x284   :  { %573 = vmatpush.bf16.msra.mxu3 %v695_v45 }
 0x285   :  { %362 = vmatpush.msrb.mxu0 %v706_v46 }
 0x287   :  { %363 = vmatpush.msrb.mxu0 %v707_v47 }
 0x28a   :  { %v710_v48 = vpop.permute.xlu2 %709 }
 0x28b   :  { %v711_v49 = vunpack.i.l.bf16 %v710_v48  ;;  %v712_v50 = vunpack.i.h.bf16 %v710_v48  ;;  %v694_v48 = vld [vmem:[%s1065_s6 + $0x30] sm:$0xff] }
 0x28c   :  { %574 = vmatpush.bf16.msra.mxu3 %v694_v48 }
 0x28d   :  { %364 = vmatpush.msrb.mxu0 %v711_v49 }
 0x28f   :  { %365 = vmatpush.msrb.mxu0 %v712_v50 }
 0x292   :  { %v715_v51 = vpop.permute.xlu2 %714 }
 0x293   :  { %v716_v52 = vunpack.i.l.bf16 %v715_v51  ;;  %v717_v53 = vunpack.i.h.bf16 %v715_v51 }
 0x295   :  { %366 = vmatpush.msrb.mxu0 %v716_v52  ;;  %v693_v52 = vld [vmem:[%s1065_s6 + $0x28] sm:$0xff] }
 0x296   :  { %575 = vmatpush.bf16.msra.mxu3 %v693_v52 }
 0x297   :  { %367 = vmatpush.msrb.mxu0 %v717_v53 }
 0x29a   :  { %v720_v54 = vpop.permute.xlu2 %719 }
 0x29b   :  { %v721_v55 = vunpack.i.l.bf16 %v720_v54  ;;  %v722_v56 = vunpack.i.h.bf16 %v720_v54 }
 0x29d   :  { %368 = vmatpush.msrb.mxu0 %v721_v55 }
 0x29f   :  { %369 = vmatpush.msrb.mxu0 %v722_v56 }
 0x2a1   :  { %407 = vmatpush.bf16.msra.mxu0 %v685_v12 }
 0x2a5   :  { %408 = vmatpush.bf16.msra.mxu0 %v684_v13  ;;  %v691_v13 = vld [vmem:[%s1065_s6 + $0x18] sm:$0xff] }
 0x2a8   :  { %v274_v58 = vpop.f32.mrf.mxu1 }
 0x2a9   :  { %v275_v59 = vadd.f32 %v274_v58, %v30_v57 }
 0x2ab   :  { %v281_v60 = vsel %vm280_vm8, %v275_v59, -inf }
 0x2ac   :  { %282 = vmax.xlane.f32.xlu1 %v281_v60 }
 0x2b0   :  { %v277_v62 = vpop.f32.mrf.mxu1 }
 0x2b1   :  { %v278_v63 = vadd.f32 %v277_v62, %v31_v61 }
 0x2b3   :  { %v284_v1 = vsel %vm280_vm8, %v278_v63, -inf }
 0x2b4   :  { %285 = vmax.xlane.f32.xlu0 %v284_v1  ;;  %v726_v1 = vld [vmem:[%s1061_s2 + $0x3] ss:$0 sm:$0xff] }
 0x31f   :  { %v283_v3 = vpop.xlane.xlu1 %282 }
 0x320   :  { %v287_v4 = vsub.f32 %v275_v59, %v283_v3 }
 0x322   :  { %v289_v5 = vmul.f32 1.442695, %v287_v4 }
 0x324   :  { %736 = vpow2.f32 %v289_v5 }
 0x327   :  { %v286_v6 = vpop.xlane.xlu0 %285 }
 0x328   :  { %v288_v7 = vsub.f32 %v278_v63, %v286_v6 }
 0x32a   :  { %v737_v8 = vpop.eup %736  ;;  %v291_v9 = vmul.f32 1.442695, %v288_v7  ;;  %v727_v7 = vld [vmem:[%s1061_s2 + $0x4] ss:$0 sm:$0xff] }
 0x32b   :  { %628 = vmatmul.msk.f32.vlgmr.msra.gmra.mxu2 %vm280_vm8, %v737_v8  ;;  %630 = vmatmul.msk.f32.vlgmr.msrb.gmra.mxu0 %vm280_vm8, %v737_v8 }
 0x32c   :  { %738 = vpow2.f32 %v291_v9 }
 0x332   :  { %v739_v11 = vpop.eup %738 }
 0x333   :  { %629 = vmatmul.msk.f32.gmra.mxu2 %vm280_vm8, %v739_v11  ;;  %631 = vmatmul.msk.f32.gmra.mxu0 %vm280_vm8, %v739_v11 }
 0x3a8   :  { %v371_v15 = vpop.f32.mrf.mxu0 }
 0x3ae   :  { %v316_v14 = vpop.f32.mrf.mxu2 }
 0x3af   :  { %740 = vrcp.f32 %v316_v14  ;;  %v690_v14 = vld [vmem:[%s1065_s6 + $0x10] sm:$0xff] }
 0x3b0   :  { %v374_v19 = vpop.f32.mrf.mxu0 }
 0x3b5   :  { %v741_v17 = vpop.eup %740 }
 0x3b6   :  { %v319_v16 = vpop.f32.mrf.mxu2  ;;  %v379_v20 = vmul.f32 %v741_v17, %v371_v15  ;;  %v689_v15 = vld [vmem:[%s1065_s6 + $0x8] sm:$0xff] }
 0x3b7   :  { %742 = vrcp.f32 %v319_v16  ;;  %v688_v16 = vld [vmem:[%s1065_s6] sm:$0xff] }
 0x3bd   :  { %v743_v18 = vpop.eup %742 }
 0x3be   :  { %v380_v21 = vmul.f32 %v743_v18, %v374_v19  ;;  %v728_v18 = vld [vmem:[%s1061_s2 + $0x6] ss:$0 sm:$0xff] }
 0x3c0   :  { %v381_v22 = vpack.c.bf16 %v380_v21, %v379_v20 }
 0x3c2   :  { %640 = vmatmul.msk.bf16.vlgmr.msra.gmra.mxu0 %vm47_vm0, %v381_v22 }
 0x43f   :  { %v410_v24 = vpop.f32.mrf.mxu0 }
 0x440   :  { %v415_v25 = vadd.f32 %v410_v24, %v824_v0 }
 0x442   :  { %v992_v26 = vadd.f32 %v725_v23, %v415_v25  ;;  %v729_v25 = vld [vmem:[%s1061_s2 + $0x5] ss:$0 sm:$0xff]  ;;  %s779_s2 = smov 128  }
 0x444   :  { %v420_v27 = vsel %vm47_vm0, %v992_v26, 0.0 }
 0x445   :  { %421 = vadd.xlane.f32.xlu2 %v420_v27 }
 0x447   :  { %v412_v28 = vpop.f32.mrf.mxu0 }
 0x448   :  { %v416_v29 = vadd.f32 %v412_v28, %v831_v2 }
 0x44a   :  { %v997_v30 = vadd.f32 %v725_v23, %v416_v29 }
 0x44c   :  { %v423_v31 = vsel %vm47_vm0, %v997_v30, 0.0 }
 0x44d   :  { %424 = vadd.xlane.f32.xlu1 %v423_v31 }
 0x4b8   :  { %v422_v32 = vpop.xlane.xlu2 %421 }
 0x4b9   :  { %v426_v33 = vmul.f32 %v422_v32, %v835_v10 }
 0x4bb   :  { %v428_v0 = vsub.f32 %v992_v26, %v426_v33 }
 0x4bd   :  { %v430_v34 = vmul.f32 %v428_v0, %v428_v0 }
 0x4bf   :  { %v432_v35 = vsel %vm47_vm0, %v430_v34, 0.0 }
 0x4c0   :  { %433 = vadd.xlane.f32.xlu0 %v432_v35  ;;  %v425_v36 = vpop.xlane.xlu1 %424 }
 0x4c1   :  { %v427_v37 = vmul.f32 %v425_v36, %v835_v10 }
 0x4c3   :  { %v429_v2 = vsub.f32 %v997_v30, %v427_v37 }
 0x4c5   :  { %v431_v38 = vmul.f32 %v429_v2, %v429_v2 }
 0x4c7   :  { %v435_v39 = vsel %vm47_vm0, %v431_v38, 0.0 }
 0x4c8   :  { %436 = vadd.xlane.f32.xlu1 %v435_v39 }
 0x533   :  { %v434_v41 = vpop.xlane.xlu0 %433 }
 0x534   :  { %v438_v43 = vmul.f32 %v434_v41, %v835_v10 }
 0x536   :  { %v440_v44 = vadd.f32 1e-05, %v438_v43 }
 0x538   :  { %744 = vrsqrt.f32 %v440_v44  ;;  %vm448_vm10 = vweird.f32 %v440_v44 }
 0x53b   :  { %v437_v46 = vpop.xlane.xlu1 %436 }
 0x53c   :  { %v439_v47 = vmul.f32 %v437_v46, %v835_v10  ;;  %v692_v10 = vld [vmem:[%s1065_s6 + $0x20] sm:$0xff]  ;;  %s778_s6 = smov [#allocation2]  }
 0x53d   :  { %576 = vmatpush.bf16.msra.mxu3 %v692_v10  ;;  %s595_s4 = sshll.u32 %s778_s6, 4  ;;  %s596_s4 = int_to_ptr.vmem [resolvable:$true] %s595_s4 }
 0x53e   :  { %v745_v49 = vpop.eup %744  ;;  %v441_v50 = vadd.f32 1e-05, %v439_v47 }
 0x53f   :  { %v443_v51 = vmul.f32 %v745_v49, %v440_v44  ;;  %vm449_vm9 = vweird.f32 %v745_v49 }
 0x540   :  { %746 = vrsqrt.f32 %v441_v50  ;;  %vm450_vm11 = vmor %vm448_vm10, %vm449_vm9  ;;  %vm458_vm13 = vweird.f32 %v441_v50 }
 0x541   :  { %v444_v53 = vmul.f32 %v745_v49, %v443_v51  ;;  %577 = vmatpush.bf16.msra.mxu3 %v691_v13 }
 0x543   :  { %v445_v54 = vmul.f32 0.5, %v444_v53 }
 0x545   :  { %v446_v55 = vsub.f32 1.5, %v445_v54  ;;  %578 = vmatpush.bf16.msra.mxu3 %v690_v14 }
 0x546   :  { %v747_v56 = vpop.eup %746 }
 0x547   :  { %v447_v57 = vmul.f32 %v745_v49, %v446_v55  ;;  %v453_v58 = vmul.f32 %v747_v56, %v441_v50  ;;  %vm459_vm12 = vweird.f32 %v747_v56 }
 0x548   :  { %vm460_vm14 = vmor %vm458_vm13, %vm459_vm12 }
 0x549   :  { %v454_v59 = vmul.f32 %v747_v56, %v453_v58  ;;  %v451_v60 = vsel %vm450_vm11, %v745_v49, %v447_v57  ;;  %579 = vmatpush.bf16.msra.mxu3 %v689_v15 }
 0x54a   :  { %v462_v63 = vmul.f32 %v451_v60, %v428_v0 }
 0x54b   :  { %v455_v61 = vmul.f32 0.5, %v454_v59 }
 0x54c   :  { %v465_v6 = vmul.f32 %v726_v1, %v462_v63 }
 0x54d   :  { %v456_v62 = vsub.f32 1.5, %v455_v61  ;;  %580 = vmatpush.bf16.msra.mxu3 %v688_v16 }
 0x54e   :  { %v468_v9 = vadd.f32 %v727_v7, %v465_v6 }
 0x54f   :  { %v457_v3 = vmul.f32 %v747_v56, %v456_v62 }
 0x551   :  { %v461_v4 = vsel %vm460_vm14, %v747_v56, %v457_v3 }
 0x552   :  { %v463_v5 = vmul.f32 %v461_v4, %v429_v2 }
 0x554   :  { %v466_v8 = vmul.f32 %v726_v1, %v463_v5 }
 0x556   :  { %v469_v11 = vadd.f32 %v727_v7, %v466_v8 }
 0x558   :  { %v470_v12 = vpack.c.bf16 %v469_v11, %v468_v9 }
 0x55a   :  { %649 = vmatmul.msk.bf16.vlgmr.msrb.gmra.mxu2 %vm47_vm0, %v470_v12 }
 0x5dd   :  { %v500_v17 = vpop.f32.mrf.mxu2 }
 0x5de   :  { %v501_v19 = vadd.f32 %v728_v18, %v500_v17 }
 0x5e0   :  { %v505_v22 = vmax.f32 %v501_v19, 0.0 }
 0x5e5   :  { %v502_v20 = vpop.f32.mrf.mxu2 }
 0x5e6   :  { %v503_v21 = vadd.f32 %v728_v18, %v502_v20 }
 0x5e8   :  { %v506_v23 = vmax.f32 %v503_v21, 0.0 }
 0x5ea   :  { %v507_v24 = vpack.c.bf16 %v506_v23, %v505_v22 }
 0x5ec   :  { %581 = vmatmul.bf16.vlgmr.msra.gmra.mxu3 %v507_v24 }
 0x66f   :  { %v582_v27 = vpop.f32.mrf.mxu3 }
 0x670   :  { %v583_v28 = vadd.f32 %v729_v25, %v582_v27 }
 0x672   :  { %v587_v29 = vadd.f32 %v583_v28, %v992_v26 }
 0x674   :  { %589 = vst.msk [vmem:[#allocation2] sm:$0xff] %vm47_vm0, %v587_v29 }
 0x677   :  { %v584_v31 = vpop.f32.mrf.mxu3 }
 0x678   :  { %v585_v32 = vadd.f32 %v729_v25, %v584_v31 }
 0x67a   :  { %v588_v33 = vadd.f32 %v585_v32, %v997_v30 }
 0x67c   :  { %590 = vst.msk [vmem:[#allocation2 + $0x8] sm:$0xff] %vm47_vm0, %v588_v33 }
 0x67d   :  { %603 = dma.vmem_to_hbm [thread:$0]  %s596_s4, 256, %s598_s16, [#allocation3], %s779_s2, %s779_s2, %s780_s17  }
 0x67e   :  { %772 = dma.done.wait [#allocation3], 256  }
 0x67f   :  { %773 = vsyncadd [#allocation3], 4294967040 }
 0x680   :  { %608 = vsyncpa [#allocation3], 1 }

</bundles_post_ra>
